<compile_context>
chip_gen: v5e
topology: v5e:2x2
jax: 0.10.0
libtpu: 0.0.40
codegen_flags: <defaults>
</compile_context>

<pallas_src>
import jax
import jax.numpy as jnp
from jax.experimental import pallas as pl
from jax.experimental.pallas import tpu as pltpu


def _round_up(x, m):
    return (x + m - 1) // m * m


def _classifier_kernel(x_ref, w_enc_ref, b_enc_ref, w_mid_ref, b_mid_ref,
                       o_ref, h_scratch):
    # text_encoder: Linear. bf16 operands on the MXU, f32 accumulation.
    h = jnp.dot(x_ref[...], w_enc_ref[...], preferred_element_type=jnp.float32)
    h_scratch[...] = h + b_enc_ref[...]
    # middle_layer: Linear + ReLU. Intermediate re-cast to bf16 for the MXU.
    y = jnp.dot(h_scratch[...].astype(jnp.bfloat16), w_mid_ref[...],
                preferred_element_type=jnp.float32)
    y = y + b_mid_ref[...]
    o_ref[...] = jnp.maximum(y, 0.0).astype(o_ref.dtype)


def classifier_forward(x, w_enc, b_enc, w_mid, b_mid, *, tile_m=128):
    """x: [N, hidden] float32 -> [N, out_dim] float32 (fused two-layer MLP)."""
    n, hidden = x.shape
    enc_dim = w_enc.shape[1]
    out_dim = w_mid.shape[1]

    # Pad rows to the row tile and all feature dims to lane-dense multiples of
    # 128. Zero padding is exact: padded K-columns contribute 0 to the dots and
    # padded output columns/rows are sliced away below.
    n_pad = _round_up(max(n, 1), tile_m)
    h_pad = _round_up(hidden, 128)
    e_pad = _round_up(enc_dim, 128)
    o_pad = _round_up(out_dim, 128)

    # bf16 MXU operands (halves weight DMA traffic); biases stay f32.
    x_p = jnp.zeros((n_pad, h_pad), jnp.bfloat16).at[:n, :hidden].set(
        x.astype(jnp.bfloat16))
    w_enc_p = jnp.zeros((h_pad, e_pad), jnp.bfloat16).at[:hidden, :enc_dim].set(
        w_enc.astype(jnp.bfloat16))
    b_enc_p = jnp.zeros((1, e_pad), jnp.float32).at[:, :enc_dim].set(
        b_enc.reshape(1, enc_dim).astype(jnp.float32))
    w_mid_p = jnp.zeros((e_pad, o_pad), jnp.bfloat16).at[:enc_dim, :out_dim].set(
        w_mid.astype(jnp.bfloat16))
    b_mid_p = jnp.zeros((1, o_pad), jnp.float32).at[:, :out_dim].set(
        b_mid.reshape(1, out_dim).astype(jnp.float32))

    grid = (n_pad // tile_m,)

    flops = 2 * n_pad * h_pad * e_pad + 2 * n_pad * e_pad * o_pad
    bytes_accessed = (x_p.size * 2 + w_enc_p.size * 2 + w_mid_p.size * 2
                      + b_enc_p.size * 4 + b_mid_p.size * 4
                      + n_pad * o_pad * 4)

    out_padded = pl.pallas_call(
        _classifier_kernel,
        out_shape=jax.ShapeDtypeStruct((n_pad, o_pad), jnp.float32),
        grid_spec=pltpu.PrefetchScalarGridSpec(
            num_scalar_prefetch=0,
            grid=grid,
            in_specs=[
                # x is row-tiled; weights/biases stay resident (same block
                # every grid step), so they are DMA'd once.
                pl.BlockSpec((tile_m, h_pad), lambda i: (i, 0)),
                pl.BlockSpec((h_pad, e_pad), lambda i: (0, 0)),
                pl.BlockSpec((1, e_pad), lambda i: (0, 0)),
                pl.BlockSpec((e_pad, o_pad), lambda i: (0, 0)),
                pl.BlockSpec((1, o_pad), lambda i: (0, 0)),
            ],
            out_specs=pl.BlockSpec((tile_m, o_pad), lambda i: (i, 0)),
            # Fused intermediate h lives in VMEM, never written to HBM.
            scratch_shapes=[pltpu.VMEM((tile_m, e_pad), jnp.float32)],
        ),
        compiler_params=pltpu.CompilerParams(
            # Row axis is independent -> shard across TCs on v7x megacore.
            dimension_semantics=("parallel",),
            # Explicit scoped-VMEM budget: fine on v5e (16 MiB default would
            # also fit these tiles) and well under v7x's 64 MiB physical.
            vmem_limit_bytes=32 * 1024 * 1024,
        ),
        cost_estimate=pl.CostEstimate(
            flops=flops, transcendentals=0, bytes_accessed=bytes_accessed),
    )(x_p, w_enc_p, b_enc_p, w_mid_p, b_mid_p)

    return out_padded[:n, :out_dim]


if __name__ == "__main__":
    # Small, deterministic shapes consistent with a text-encoder + middle layer.
    batch, seq, hidden, mid_dim = 2, 8, 32, 16

    key = jax.random.PRNGKey(0)
    kx, k1, k2, k3, k4 = jax.random.split(key, 5)

    x = jax.random.normal(kx, (batch, seq, hidden), dtype=jnp.float32)
    w_enc = jax.random.normal(k1, (hidden, hidden), dtype=jnp.float32) * 0.05
    b_enc = jax.random.normal(k2, (1, hidden), dtype=jnp.float32) * 0.01
    w_mid = jax.random.normal(k3, (hidden, mid_dim), dtype=jnp.float32) * 0.05
    b_mid = jax.random.normal(k4, (1, mid_dim), dtype=jnp.float32) * 0.01

    x2d = x.reshape(batch * seq, hidden)  # [batch*seq, hidden]

    out = classifier_forward(x2d, w_enc, b_enc, w_mid, b_mid)
    out = jax.block_until_ready(out)

    # Reference path mirroring the kernel's bf16-input / f32-accumulate math.
    xb = x2d.astype(jnp.bfloat16).astype(jnp.float32)
    web = w_enc.astype(jnp.bfloat16).astype(jnp.float32)
    wmb = w_mid.astype(jnp.bfloat16).astype(jnp.float32)
    h_ref = xb @ web + b_enc
    h_ref = h_ref.astype(jnp.bfloat16).astype(jnp.float32)
    ref = jnp.maximum(h_ref @ wmb + b_mid, 0.0)

    assert out.shape == (batch * seq, mid_dim)
    assert jnp.allclose(out, ref, atol=2e-2, rtol=2e-2), (
        float(jnp.max(jnp.abs(out - ref))))

    print("KERNEL_OK")
</pallas_src>

<mosaic_0001>
module attributes {stable_mosaic.version = 11 : i64} {
  func.func @_classifier_kernel(%arg0: i32, %arg1: memref<128x128xbf16, #tpu.memory_space<vmem>>, %arg2: memref<128x128xbf16, #tpu.memory_space<vmem>>, %arg3: memref<1x128xf32, #tpu.memory_space<vmem>>, %arg4: memref<128x128xbf16, #tpu.memory_space<vmem>>, %arg5: memref<1x128xf32, #tpu.memory_space<vmem>>, %arg6: memref<128x128xf32, #tpu.memory_space<vmem>>, %arg7: memref<128x128xf32, #tpu.memory_space<vmem>>) attributes {dimension_semantics = [#tpu.dimension_semantics<parallel>], iteration_bounds = array<i64: 1>, scalar_prefetch = 0 : i64, scratch_operands = 1 : i64, tpu.core_type = #tpu.core_type<tc>, window_params = [{transform_indices = @transform_0, window_bounds = array<i64: 128, 128>}, {pipeline_mode = #tpu.pipeline_mode<synchronous>, transform_indices = @transform_1, window_bounds = array<i64: 128, 128>}, {pipeline_mode = #tpu.pipeline_mode<synchronous>, transform_indices = @transform_2, window_bounds = array<i64: 1, 128>}, {pipeline_mode = #tpu.pipeline_mode<synchronous>, transform_indices = @transform_3, window_bounds = array<i64: 128, 128>}, {pipeline_mode = #tpu.pipeline_mode<synchronous>, transform_indices = @transform_4, window_bounds = array<i64: 1, 128>}, {transform_indices = @transform_5, window_bounds = array<i64: 128, 128>}]} {
    %c0 = arith.constant 0 : index
    %c0_0 = arith.constant 0 : index
    %0 = vector.load %arg1[%c0, %c0_0] : memref<128x128xbf16, #tpu.memory_space<vmem>>, vector<128x128xbf16>
    %c0_1 = arith.constant 0 : index
    %c0_2 = arith.constant 0 : index
    %1 = vector.load %arg2[%c0_1, %c0_2] : memref<128x128xbf16, #tpu.memory_space<vmem>>, vector<128x128xbf16>
    %cst = arith.constant dense<0.000000e+00> : vector<128x128xf32>
    %2 = tpu.matmul %0, %1, %cst {dimension_numbers = #tpu.dot_dimension_numbers<[1], [0], [0], [1], [0, 0, 1, 1], [], []>} : vector<128x128xbf16>, vector<128x128xbf16>, vector<128x128xf32> -> vector<128x128xf32>
    %c0_3 = arith.constant 0 : index
    %c0_4 = arith.constant 0 : index
    %3 = vector.load %arg3[%c0_3, %c0_4] : memref<1x128xf32, #tpu.memory_space<vmem>>, vector<1x128xf32>
    %4 = vector.broadcast %3 : vector<1x128xf32> to vector<128x128xf32>
    %5 = arith.addf %2, %4 : vector<128x128xf32>
    %c0_5 = arith.constant 0 : index
    %c0_6 = arith.constant 0 : index
    %6 = vector.load %arg7[%c0_5, %c0_6] : memref<128x128xf32, #tpu.memory_space<vmem>>, vector<128x128xf32>
    tpu.vector_store %arg7[%c0_5, %c0_6], %5 {strides = array<i32>} : memref<128x128xf32, #tpu.memory_space<vmem>>, vector<128x128xf32>,
    %c0_7 = arith.constant 0 : index
    %c0_8 = arith.constant 0 : index
    %7 = vector.load %arg7[%c0_7, %c0_8] : memref<128x128xf32, #tpu.memory_space<vmem>>, vector<128x128xf32>
    %8 = arith.truncf %7 : vector<128x128xf32> to vector<128x128xbf16>
    %c0_9 = arith.constant 0 : index
    %c0_10 = arith.constant 0 : index
    %9 = vector.load %arg4[%c0_9, %c0_10] : memref<128x128xbf16, #tpu.memory_space<vmem>>, vector<128x128xbf16>
    %cst_11 = arith.constant dense<0.000000e+00> : vector<128x128xf32>
    %10 = tpu.matmul %8, %9, %cst_11 {dimension_numbers = #tpu.dot_dimension_numbers<[1], [0], [0], [1], [0, 0, 1, 1], [], []>} : vector<128x128xbf16>, vector<128x128xbf16>, vector<128x128xf32> -> vector<128x128xf32>
    %c0_12 = arith.constant 0 : index
    %c0_13 = arith.constant 0 : index
    %11 = vector.load %arg5[%c0_12, %c0_13] : memref<1x128xf32, #tpu.memory_space<vmem>>, vector<1x128xf32>
    %12 = vector.broadcast %11 : vector<1x128xf32> to vector<128x128xf32>
    %13 = arith.addf %10, %12 : vector<128x128xf32>
    %cst_14 = arith.constant 0.000000e+00 : f32
    %14 = vector.broadcast %cst_14 : f32 to vector<128x128xf32>
    %15 = arith.maximumf %13, %14 : vector<128x128xf32>
    %c0_15 = arith.constant 0 : index
    %c0_16 = arith.constant 0 : index
    %16 = vector.load %arg6[%c0_15, %c0_16] : memref<128x128xf32, #tpu.memory_space<vmem>>, vector<128x128xf32>
    tpu.vector_store %arg6[%c0_15, %c0_16], %15 {strides = array<i32>} : memref<128x128xf32, #tpu.memory_space<vmem>>, vector<128x128xf32>,
    return
  }
  func.func @transform_0(%arg0: i32) -> (i32, i32) {
    %c0_i32 = arith.constant 0 : i32
    %c0_i32_0 = arith.constant 0 : i32
    return %arg0, %c0_i32 : i32, i32
  }
  func.func @transform_1(%arg0: i32) -> (i32, i32) {
    %c0_i32 = arith.constant 0 : i32
    %c0_i32_0 = arith.constant 0 : i32
    %c0_i32_1 = arith.constant 0 : i32
    return %c0_i32, %c0_i32_0 : i32, i32
  }
  func.func @transform_2(%arg0: i32) -> (i32, i32) {
    %c0_i32 = arith.constant 0 : i32
    %c0_i32_0 = arith.constant 0 : i32
    %c0_i32_1 = arith.constant 0 : i32
    return %c0_i32, %c0_i32_0 : i32, i32
  }
  func.func @transform_3(%arg0: i32) -> (i32, i32) {
    %c0_i32 = arith.constant 0 : i32
    %c0_i32_0 = arith.constant 0 : i32
    %c0_i32_1 = arith.constant 0 : i32
    return %c0_i32, %c0_i32_0 : i32, i32
  }
  func.func @transform_4(%arg0: i32) -> (i32, i32) {
    %c0_i32 = arith.constant 0 : i32
    %c0_i32_0 = arith.constant 0 : i32
    %c0_i32_1 = arith.constant 0 : i32
    return %c0_i32, %c0_i32_0 : i32, i32
  }
  func.func @transform_5(%arg0: i32) -> (i32, i32) {
    %c0_i32 = arith.constant 0 : i32
    %c0_i32_0 = arith.constant 0 : i32
    return %arg0, %c0_i32 : i32, i32
  }
}

</mosaic_0001>

<bundles_post_ra>
// kernel: tpu_custom_call.1
= control target key start
LH: loop header
LB: loop body
LE: loop exit
PB: predicated region body
PF: predicated region fallthrough
CT: control target
= control target key end

     0   :  { %10 = vsyncpa [#allocation4], 0  ;;  %s780_s0 = inlined_call_operand.hbm [shape: bf16[128,128], index: 0, kind: input, shape index: {}]   ;;  %s781_s1 = inlined_call_operand.hbm [shape: bf16[128,128], index: 1, kind: input, shape index: {}]   ;;  %s782_s2 = inlined_call_operand.vmem [shape: f32[1,128], index: 2, kind: input, shape index: {}]   ;;  %s783_s3 = inlined_call_operand.hbm [shape: bf16[128,128], index: 3, kind: input, shape index: {}]   ;;  %s784_s4 = inlined_call_operand.vmem [shape: f32[1,128], index: 4, kind: input, shape index: {}]   ;;  %s785_s5 = inlined_call_operand.hbm [shape: f32[128,128], index: 5, kind: output, shape index: {}]  }
   0x1   :  { %11 = vsyncpa [#allocation7], 0 }
   0x2   :  { %12 = vsyncpa [#allocation5], 0  ;;  %s30_s20 = sshll.u32 %s781_s1, 4  ;;  %s706_s21 = smov [#allocation6]   ;;  %s31_s20 = int_to_ptr.hbm [resolvable:$true] %s30_s20 }
   0x3   :  { %s32_s22 = sshll.u32 %s706_s21, 4  ;;  %s17_s25 = sshll.u32 %s780_s0, 4  ;;  %s33_s22 = int_to_ptr.vmem [resolvable:$true] %s32_s22  ;;  %s18_s25 = int_to_ptr.hbm [resolvable:$true] %s17_s25 }
   0x4   :  { %s707_s26 = smov 64   ;;  %s708_s27 = smov 4  }
   0x5   :  { %38 = dma.hbm_to_vmem [thread:$0]  %s31_s20, 1024, %s33_s22, [#allocation7], %s707_s26, %s707_s26, %s708_s27  }
   0x6   :  { %s709_s28 = smov [#allocation3]   ;;  %s45_s7 = sshll.u32 %s783_s3, 4  ;;  %s46_s7 = int_to_ptr.hbm [resolvable:$true] %s45_s7 }
   0x7   :  { %s19_s29 = sshll.u32 %s709_s28, 4  ;;  %s710_s1 = smov [#allocation8]   ;;  %s20_s29 = int_to_ptr.vmem [resolvable:$true] %s19_s29 }
   0x8   :  { %25 = dma.hbm_to_vmem [thread:$0]  %s18_s25, 1024, %s20_s29, [#allocation4], %s707_s26, %s707_s26, %s708_s27  }
   0x9   :  { %s47_s8 = sshll.u32 %s710_s1, 4  ;;  %s48_s8 = int_to_ptr.vmem [resolvable:$true] %s47_s8 }
   0xa   :  { %53 = dma.hbm_to_vmem [thread:$0]  %s46_s7, 1024, %s48_s8, [#allocation7], %s707_s26, %s707_s26, %s708_s27  }
   0xb   :  { %700 = dma.done.wait [#allocation4], 1024  }
   0xc   :  { %701 = vsyncadd [#allocation4], 4294966272 }
   0xd   :  { %702 = dma.done.wait [#allocation7], 2048  }
   0xe   :  { %703 = vsyncadd [#allocation7], 4294965248  ;;  %v569_v0 = vld [vmem:[#allocation6 + $0x38] sm:$0xff]  ;;  %v568_v1 = vld [vmem:[#allocation6 + $0x30] sm:$0xff]  ;;  %s444_s13 = sshll.u32 %s785_s5, 4  ;;  %s712_s14 = smov 128   ;;  %s445_s13 = int_to_ptr.hbm [resolvable:$true] %s444_s13 }
   0xf   :  { %200 = vmatpush.bf16.msra.mxu0 %v569_v0  ;;  %578 = vmatpush.bf16.msra.mxu2 %v569_v0  ;;  %v567_v2 = vld [vmem:[#allocation6 + $0x28] sm:$0xff]  ;;  %v566_v3 = vld [vmem:[#allocation6 + $0x20] sm:$0xff]  ;;  %v565_v4 = vld [vmem:[#allocation6 + $0x18] sm:$0xff]  ;;  %s713_s15 = smov 8  }
  0x10   :  { %v564_v5 = vld [vmem:[#allocation6 + $0x10] sm:$0xff]  ;;  %v563_v6 = vld [vmem:[#allocation6 + $0x8] sm:$0xff]  ;;  %v562_v7 = vld [vmem:[#allocation6] sm:$0xff] }
  0x11   :  { %v554_v8 = vld [vmem:[#allocation3] sm:$0xff]  ;;  %v555_v10 = vld [vmem:[#allocation3 + $0x8] sm:$0xff]  ;;  %v577_v12 = vld [vmem:[#allocation8 + $0x38] sm:$0xff] }
  0x12   :  { %v558_v9 = vld [vmem:[#allocation3 + $0x20] sm:$0xff]  ;;  %v559_v11 = vld [vmem:[#allocation3 + $0x28] sm:$0xff]  ;;  %357 = vmatpush.bf16.msra.mxu1 %v577_v12  ;;  %v576_v13 = vld [vmem:[#allocation8 + $0x30] sm:$0xff]  ;;  %586 = vmatpush.bf16.msra.mxu3 %v577_v12 }
  0x13   :  { %201 = vmatpush.bf16.msra.mxu0 %v568_v1  ;;  %579 = vmatpush.bf16.msra.mxu2 %v568_v1  ;;  %v575_v14 = vld [vmem:[#allocation8 + $0x28] sm:$0xff]  ;;  %v574_v15 = vld [vmem:[#allocation8 + $0x20] sm:$0xff]  ;;  %v556_v16 = vld [vmem:[#allocation3 + $0x10] sm:$0xff] }
  0x14   :  { %v560_v17 = vld [vmem:[#allocation3 + $0x30] sm:$0xff]  ;;  %v573_v18 = vld [vmem:[#allocation8 + $0x18] sm:$0xff]  ;;  %v571_v22 = vld [vmem:[#allocation8 + $0x8] sm:$0xff] }
  0x15   :  { %v557_v19 = vld [vmem:[#allocation3 + $0x18] sm:$0xff]  ;;  %v572_v21 = vld [vmem:[#allocation8 + $0x10] sm:$0xff]  ;;  %v570_v23 = vld [vmem:[#allocation8] sm:$0xff] }
  0x16   :  { %358 = vmatpush.bf16.msra.mxu1 %v576_v13  ;;  %587 = vmatpush.bf16.msra.mxu3 %v576_v13  ;;  %v561_v20 = vld [vmem:[#allocation3 + $0x38] sm:$0xff]  ;;  %v602_v25 = vld [vmem:[%s782_s2] ss:$0 sm:$0xff] }
  0x17   :  { %202 = vmatpush.bf16.msra.mxu0 %v567_v2  ;;  %580 = vmatpush.bf16.msra.mxu2 %v567_v2  ;;  %v759_v1 = vld [vmem:[%s784_s4] ss:$0 sm:$0xff]  ;;  %s711_s4 = smov [#allocation9]  }
  0x18   :  { %s442_s10 = sshll.u32 %s711_s4, 4  ;;  %s443_s10 = int_to_ptr.vmem [resolvable:$true] %s442_s10 }
  0x1a   :  { %359 = vmatpush.bf16.msra.mxu1 %v575_v14  ;;  %588 = vmatpush.bf16.msra.mxu3 %v575_v14 }
  0x1b   :  { %203 = vmatpush.bf16.msra.mxu0 %v566_v3  ;;  %581 = vmatpush.bf16.msra.mxu2 %v566_v3 }
  0x1e   :  { %360 = vmatpush.bf16.msra.mxu1 %v574_v15  ;;  %589 = vmatpush.bf16.msra.mxu3 %v574_v15 }
  0x1f   :  { %204 = vmatpush.bf16.msra.mxu0 %v565_v4  ;;  %582 = vmatpush.bf16.msra.mxu2 %v565_v4 }
  0x22   :  { %361 = vmatpush.bf16.msra.mxu1 %v573_v18  ;;  %590 = vmatpush.bf16.msra.mxu3 %v573_v18 }
  0x23   :  { %205 = vmatpush.bf16.msra.mxu0 %v564_v5  ;;  %583 = vmatpush.bf16.msra.mxu2 %v564_v5 }
  0x26   :  { %362 = vmatpush.bf16.msra.mxu1 %v572_v21  ;;  %591 = vmatpush.bf16.msra.mxu3 %v572_v21 }
  0x27   :  { %206 = vmatpush.bf16.msra.mxu0 %v563_v6  ;;  %584 = vmatpush.bf16.msra.mxu2 %v563_v6 }
  0x2a   :  { %363 = vmatpush.bf16.msra.mxu1 %v571_v22  ;;  %592 = vmatpush.bf16.msra.mxu3 %v571_v22 }
  0x2b   :  { %207 = vmatpush.bf16.msra.mxu0 %v562_v7  ;;  %585 = vmatpush.bf16.msra.mxu2 %v562_v7 }
  0x2e   :  { %208 = vmatmul.bf16.vlgmr.msra.gmra.mxu0 %v554_v8  ;;  %228 = vmatmul.bf16.vlgmr.msra.gmra.mxu2 %v558_v9 }
  0x2f   :  { %364 = vmatpush.bf16.msra.mxu1 %v570_v23  ;;  %593 = vmatpush.bf16.msra.mxu3 %v570_v23 }
  0x3e   :  { %213 = vmatmul.bf16.gmra.mxu0 %v555_v10  ;;  %233 = vmatmul.bf16.gmra.mxu2 %v559_v11 }
  0x4e   :  { %218 = vmatmul.bf16.gmra.mxu0 %v556_v16  ;;  %238 = vmatmul.bf16.gmra.mxu2 %v560_v17 }
  0x5e   :  { %223 = vmatmul.bf16.gmra.mxu0 %v557_v19  ;;  %243 = vmatmul.bf16.gmra.mxu2 %v561_v20 }
  0xab   :  { %v209_v24 = vpop.f32.mrf.mxu0 }
  0xac   :  { %v210_v27 = vadd.f32 %v602_v25, %v209_v24 }
  0xb1   :  { %v229_v26 = vpop.f32.mrf.mxu2 }
  0xb2   :  { %v230_v32 = vadd.f32 %v602_v25, %v229_v26 }
  0xb3   :  { %v211_v28 = vpop.f32.mrf.mxu0 }
  0xb4   :  { %v212_v29 = vadd.f32 %v602_v25, %v211_v28 }
  0xb6   :  { %v281_v30 = vpack.c.bf16 %v212_v29, %v210_v27 }
  0xb8   :  { %365 = vmatmul.bf16.vlgmr.msra.gmra.mxu1 %v281_v30 }
  0xb9   :  { %v231_v31 = vpop.f32.mrf.mxu2 }
  0xba   :  { %v232_v33 = vadd.f32 %v602_v25, %v231_v31 }
  0xbb   :  { %v214_v34 = vpop.f32.mrf.mxu0 }
  0xbc   :  { %v285_v35 = vpack.c.bf16 %v232_v33, %v230_v32  ;;  %v215_v37 = vadd.f32 %v602_v25, %v214_v34 }
  0xbe   :  { %385 = vmatmul.bf16.vlgmr.msra.gmra.mxu3 %v285_v35 }
  0xc1   :  { %v234_v36 = vpop.f32.mrf.mxu2 }
  0xc2   :  { %v235_v42 = vadd.f32 %v602_v25, %v234_v36 }
  0xc3   :  { %v216_v38 = vpop.f32.mrf.mxu0 }
  0xc4   :  { %v217_v39 = vadd.f32 %v602_v25, %v216_v38 }
  0xc6   :  { %v282_v40 = vpack.c.bf16 %v217_v39, %v215_v37 }
  0xc8   :  { %370 = vmatmul.bf16.gmra.mxu1 %v282_v40 }
  0xc9   :  { %v236_v41 = vpop.f32.mrf.mxu2 }
  0xca   :  { %v237_v43 = vadd.f32 %v602_v25, %v236_v41 }
  0xcb   :  { %v219_v44 = vpop.f32.mrf.mxu0 }
  0xcc   :  { %v286_v45 = vpack.c.bf16 %v237_v43, %v235_v42  ;;  %v220_v47 = vadd.f32 %v602_v25, %v219_v44 }
  0xce   :  { %390 = vmatmul.bf16.gmra.mxu3 %v286_v45 }
  0xd1   :  { %v239_v46 = vpop.f32.mrf.mxu2 }
  0xd2   :  { %v240_v52 = vadd.f32 %v602_v25, %v239_v46 }
  0xd3   :  { %v221_v48 = vpop.f32.mrf.mxu0 }
  0xd4   :  { %v222_v49 = vadd.f32 %v602_v25, %v221_v48 }
  0xd6   :  { %v283_v50 = vpack.c.bf16 %v222_v49, %v220_v47 }
  0xd8   :  { %375 = vmatmul.bf16.gmra.mxu1 %v283_v50 }
  0xd9   :  { %v241_v51 = vpop.f32.mrf.mxu2 }
  0xda   :  { %v242_v53 = vadd.f32 %v602_v25, %v241_v51 }
  0xdb   :  { %v224_v54 = vpop.f32.mrf.mxu0 }
  0xdc   :  { %v287_v55 = vpack.c.bf16 %v242_v53, %v240_v52  ;;  %v225_v57 = vadd.f32 %v602_v25, %v224_v54 }
  0xde   :  { %395 = vmatmul.bf16.gmra.mxu3 %v287_v55 }
  0xe1   :  { %v244_v56 = vpop.f32.mrf.mxu2 }
  0xe2   :  { %v245_v62 = vadd.f32 %v602_v25, %v244_v56 }
  0xe3   :  { %v226_v58 = vpop.f32.mrf.mxu0 }
  0xe4   :  { %v227_v59 = vadd.f32 %v602_v25, %v226_v58 }
  0xe6   :  { %v284_v60 = vpack.c.bf16 %v227_v59, %v225_v57 }
  0xe8   :  { %380 = vmatmul.bf16.gmra.mxu1 %v284_v60 }
  0xe9   :  { %v246_v61 = vpop.f32.mrf.mxu2 }
  0xea   :  { %v247_v63 = vadd.f32 %v602_v25, %v246_v61 }
  0xec   :  { %v288_v0 = vpack.c.bf16 %v247_v63, %v245_v62 }
  0xee   :  { %400 = vmatmul.bf16.gmra.mxu3 %v288_v0 }
 0x135   :  { %v366_v2 = vpop.f32.mrf.mxu1 }
 0x136   :  { %v367_v3 = vadd.f32 %v759_v1, %v366_v2 }
 0x138   :  { %v406_v4 = vmax.f32 %v367_v3, 0.0 }
 0x13a   :  { %422 = vst [vmem:[#allocation9] sm:$0xff] %v406_v4 }
 0x13d   :  { %v368_v5 = vpop.f32.mrf.mxu1 }
 0x13e   :  { %v369_v6 = vadd.f32 %v759_v1, %v368_v5 }
 0x140   :  { %v407_v7 = vmax.f32 %v369_v6, 0.0 }
 0x141   :  { %v386_v8 = vpop.f32.mrf.mxu3 }
 0x142   :  { %423 = vst [vmem:[#allocation9 + $0x8] sm:$0xff] %v407_v7  ;;  %v387_v9 = vadd.f32 %v759_v1, %v386_v8 }
 0x144   :  { %v414_v10 = vmax.f32 %v387_v9, 0.0 }
 0x145   :  { %v371_v11 = vpop.f32.mrf.mxu1 }
 0x146   :  { %430 = vst [vmem:[#allocation9 + $0x40] sm:$0xff] %v414_v10  ;;  %v372_v12 = vadd.f32 %v759_v1, %v371_v11 }
 0x148   :  { %v408_v13 = vmax.f32 %v372_v12, 0.0 }
 0x149   :  { %v388_v14 = vpop.f32.mrf.mxu3 }
 0x14a   :  { %424 = vst [vmem:[#allocation9 + $0x10] sm:$0xff] %v408_v13  ;;  %v389_v15 = vadd.f32 %v759_v1, %v388_v14 }
 0x14c   :  { %v415_v16 = vmax.f32 %v389_v15, 0.0 }
 0x14d   :  { %v373_v17 = vpop.f32.mrf.mxu1 }
 0x14e   :  { %431 = vst [vmem:[#allocation9 + $0x48] sm:$0xff] %v415_v16  ;;  %v374_v18 = vadd.f32 %v759_v1, %v373_v17 }
 0x150   :  { %v409_v19 = vmax.f32 %v374_v18, 0.0 }
 0x151   :  { %v391_v20 = vpop.f32.mrf.mxu3 }
 0x152   :  { %425 = vst [vmem:[#allocation9 + $0x18] sm:$0xff] %v409_v19  ;;  %v392_v21 = vadd.f32 %v759_v1, %v391_v20 }
 0x154   :  { %v416_v22 = vmax.f32 %v392_v21, 0.0 }
 0x155   :  { %v376_v23 = vpop.f32.mrf.mxu1 }
 0x156   :  { %432 = vst [vmem:[#allocation9 + $0x50] sm:$0xff] %v416_v22  ;;  %v377_v24 = vadd.f32 %v759_v1, %v376_v23 }
 0x158   :  { %v410_v25 = vmax.f32 %v377_v24, 0.0 }
 0x159   :  { %v393_v26 = vpop.f32.mrf.mxu3 }
 0x15a   :  { %426 = vst [vmem:[#allocation9 + $0x20] sm:$0xff] %v410_v25  ;;  %v394_v27 = vadd.f32 %v759_v1, %v393_v26 }
 0x15c   :  { %v417_v28 = vmax.f32 %v394_v27, 0.0 }
 0x15d   :  { %v378_v29 = vpop.f32.mrf.mxu1 }
 0x15e   :  { %433 = vst [vmem:[#allocation9 + $0x58] sm:$0xff] %v417_v28  ;;  %v379_v30 = vadd.f32 %v759_v1, %v378_v29 }
 0x160   :  { %v411_v31 = vmax.f32 %v379_v30, 0.0 }
 0x161   :  { %v396_v32 = vpop.f32.mrf.mxu3 }
 0x162   :  { %427 = vst [vmem:[#allocation9 + $0x28] sm:$0xff] %v411_v31  ;;  %v397_v33 = vadd.f32 %v759_v1, %v396_v32 }
 0x164   :  { %v418_v34 = vmax.f32 %v397_v33, 0.0 }
 0x165   :  { %v381_v35 = vpop.f32.mrf.mxu1 }
 0x166   :  { %434 = vst [vmem:[#allocation9 + $0x60] sm:$0xff] %v418_v34  ;;  %v382_v36 = vadd.f32 %v759_v1, %v381_v35 }
 0x168   :  { %v412_v37 = vmax.f32 %v382_v36, 0.0 }
 0x169   :  { %v398_v38 = vpop.f32.mrf.mxu3 }
 0x16a   :  { %428 = vst [vmem:[#allocation9 + $0x30] sm:$0xff] %v412_v37  ;;  %v399_v39 = vadd.f32 %v759_v1, %v398_v38 }
 0x16c   :  { %v419_v40 = vmax.f32 %v399_v39, 0.0 }
 0x16d   :  { %v383_v41 = vpop.f32.mrf.mxu1 }
 0x16e   :  { %435 = vst [vmem:[#allocation9 + $0x68] sm:$0xff] %v419_v40  ;;  %v384_v42 = vadd.f32 %v759_v1, %v383_v41 }
 0x170   :  { %v413_v43 = vmax.f32 %v384_v42, 0.0 }
 0x171   :  { %v401_v44 = vpop.f32.mrf.mxu3 }
 0x172   :  { %429 = vst [vmem:[#allocation9 + $0x38] sm:$0xff] %v413_v43  ;;  %v402_v45 = vadd.f32 %v759_v1, %v401_v44 }
 0x174   :  { %v420_v46 = vmax.f32 %v402_v45, 0.0 }
 0x176   :  { %436 = vst [vmem:[#allocation9 + $0x70] sm:$0xff] %v420_v46 }
 0x179   :  { %v403_v47 = vpop.f32.mrf.mxu3 }
 0x17a   :  { %v404_v48 = vadd.f32 %v759_v1, %v403_v47 }
 0x17c   :  { %v421_v49 = vmax.f32 %v404_v48, 0.0 }
 0x17e   :  { %437 = vst [vmem:[#allocation9 + $0x78] sm:$0xff] %v421_v49 }
 0x17f   :  { %450 = dma.vmem_to_hbm [thread:$0]  %s443_s10, 2048, %s445_s13, [#allocation5], %s712_s14, %s712_s14, %s713_s15  }
 0x180   :  { %704 = dma.done.wait [#allocation5], 2048  }
 0x181   :  { %705 = vsyncadd [#allocation5], 4294965248 }
 0x182   :  { %455 = vsyncpa [#allocation4], 1 }
 0x183   :  { %456 = vsyncpa [#allocation7], 1 }
 0x184   :  { %457 = vsyncpa [#allocation5], 1 }

</bundles_post_ra>
